<compile_context>
chip_gen: v6e
topology: v6e:2x2x1
jax: 0.10.0
libtpu: 0.0.40
codegen_flags: <defaults>
</compile_context>

<pallas_src>
import functools

import jax
import jax.numpy as jnp
from jax.experimental import pallas as pl
from jax.experimental.pallas import tpu as pltpu


# --------------------------------------------------------------------------
# Kernels
# --------------------------------------------------------------------------
def _mm_kernel_single(x_ref, w_ref, o_ref):
    """Single K step: write the output tile directly (no accumulator)."""
    o_ref[...] = jnp.dot(
        x_ref[...], w_ref[...], preferred_element_type=jnp.float32
    ).astype(o_ref.dtype)


def _mm_kernel_acc_out(x_ref, w_ref, o_ref):
    """Multi-K, f32 output: accumulate directly into the resident out tile.

    k == 0 writes the partial product (no separate zero-init pass);
    k > 0 accumulates.
    """
    k = pl.program_id(2)
    partial = jnp.dot(x_ref[...], w_ref[...], preferred_element_type=jnp.float32)

    @pl.when(k == 0)
    def _():
        o_ref[...] = partial

    @pl.when(k > 0)
    def _():
        o_ref[...] += partial


def _mm_kernel_acc_scratch(x_ref, w_ref, o_ref, acc_ref):
    """Multi-K, non-f32 output: f32 scratch accumulator, cast on last step."""
    k = pl.program_id(2)
    partial = jnp.dot(x_ref[...], w_ref[...], preferred_element_type=jnp.float32)

    @pl.when(k == 0)
    def _():
        acc_ref[...] = partial

    @pl.when(k > 0)
    def _():
        acc_ref[...] += partial

    @pl.when(k == pl.num_programs(2) - 1)
    def _():
        o_ref[...] = acc_ref[...].astype(o_ref.dtype)


# --------------------------------------------------------------------------
# Tiling helpers
# --------------------------------------------------------------------------
def _round_up(x: int, m: int) -> int:
    return ((x + m - 1) // m) * m


def _vmem_usage(tm, tn, tk, in_item, out_item, needs_scratch):
    # Double-buffered inputs + double-buffered output (+ f32 scratch).
    b = 2 * (tm * tk + tk * tn) * in_item + 2 * tm * tn * out_item
    if needs_scratch:
        b += tm * tn * 4
    return b


def _choose_tiles(M, K, N, tm_pref, tn_pref, tk_pref,
                  in_item, out_item, needs_scratch, budget_bytes):
    sub_m = 16 if in_item == 2 else 8          # sublane packing of the M axis

    tm = min(tm_pref, _round_up(M, sub_m))
    tn = min(tn_pref, _round_up(N, 128))
    tk = min(tk_pref, _round_up(K, 128))

    # v7x dual-TC: make sure the "parallel" N axis has >= 2 blocks when it can.
    n128 = _round_up(N, 128)
    if n128 >= 256 and tn >= n128:
        tn = max(128, (n128 // 2) // 128 * 128)

    # Stay under the VMEM budget (v7x has 64 MiB physical, 32 MiB scoped default).
    while _vmem_usage(tm, tn, tk, in_item, out_item, needs_scratch) > budget_bytes and tk > 128:
        tk = max(128, _round_up(tk // 2, 128))
    while _vmem_usage(tm, tn, tk, in_item, out_item, needs_scratch) > budget_bytes and tn > 128:
        tn = max(128, _round_up(tn // 2, 128))
    while _vmem_usage(tm, tn, tk, in_item, out_item, needs_scratch) > budget_bytes and tm > sub_m:
        tm = max(sub_m, _round_up(tm // 2, sub_m))

    return tm, tn, tk


# --------------------------------------------------------------------------
# Forward pass
# --------------------------------------------------------------------------
@functools.partial(
    jax.jit,
    static_argnames=("compute_dtype", "tm", "tn", "tk", "vmem_budget_bytes"),
)
def spose_forward(x, w_t, *, compute_dtype=jnp.bfloat16,
                  tm=512, tn=512, tk=1024, vmem_budget_bytes=24 * 1024 * 1024):
    """y = x @ w_t, where w_t = W.T has shape (in_size, out_size).

    Returns x.dtype (accumulation is always f32). Operands are cast to
    `compute_dtype` (bf16 by default; pass None to keep them as-is).
    """
    M, K = x.shape
    K2, N = w_t.shape
    assert K == K2, "feature dimensions must match"

    out_dtype = x.dtype
    if compute_dtype is not None:
        x = x.astype(compute_dtype)
        w_t = w_t.astype(compute_dtype)

    in_item = jnp.dtype(x.dtype).itemsize
    out_item = jnp.dtype(out_dtype).itemsize
    needs_scratch_if_multik = out_dtype != jnp.float32

    tm, tn, tk = _choose_tiles(M, K, N, tm, tn, tk,
                               in_item, out_item, needs_scratch_if_multik,
                               vmem_budget_bytes)

    # Pad everything to tile multiples outside the kernel (zero K-padding is
    # exact for the reduction; extra M rows / N cols are sliced off after).
    Mp, Kp, Np = _round_up(M, tm), _round_up(K, tk), _round_up(N, tn)
    if (Mp, Kp) != (M, K):
        x = jnp.pad(x, ((0, Mp - M), (0, Kp - K)))
    if (Kp, Np) != (K, N):
        w_t = jnp.pad(w_t, ((0, Kp - K), (0, Np - N)))

    nm, nn_, nk = Mp // tm, Np // tn, Kp // tk
    grid = (nm, nn_, nk)

    in_specs = [
        pl.BlockSpec((tm, tk), lambda i, j, k: (i, k)),   # x tile
        # TODO(synk): on v7x, consider pipeline_mode=pl.Buffered(3) here if
        # profiling shows exposed DMA latency on the streamed weight operand.
        pl.BlockSpec((tk, tn), lambda i, j, k: (k, j)),   # w_t tile
    ]
    out_spec = pl.BlockSpec((tm, tn), lambda i, j, k: (i, j))

    if nk == 1:
        kernel = _mm_kernel_single
        scratch_shapes = []
    elif out_dtype == jnp.float32:
        kernel = _mm_kernel_acc_out
        scratch_shapes = []
    else:
        kernel = _mm_kernel_acc_scratch
        scratch_shapes = [pltpu.VMEM((tm, tn), jnp.float32)]

    vmem_est = _vmem_usage(tm, tn, tk, in_item, out_item, bool(scratch_shapes))
    vmem_limit = int(min(48 * 1024 * 1024, max(32 * 1024 * 1024, 2 * vmem_est)))

    cost = pl.CostEstimate(
        flops=2 * Mp * Np * Kp,
        transcendentals=0,
        bytes_accessed=(Mp * Kp + Kp * Np) * in_item + Mp * Np * out_item,
    )

    y = pl.pallas_call(
        kernel,
        out_shape=jax.ShapeDtypeStruct((Mp, Np), out_dtype),
        grid_spec=pltpu.PrefetchScalarGridSpec(
            num_scalar_prefetch=0,
            grid=grid,
            in_specs=in_specs,
            out_specs=out_spec,
            scratch_shapes=scratch_shapes,
        ),
        compiler_params=pltpu.CompilerParams(
            dimension_semantics=("parallel", "parallel", "arbitrary"),
            vmem_limit_bytes=vmem_limit,
        ),
        cost_estimate=cost,
    )(x, w_t)

    if (Mp, Np) != (M, N):
        y = y[:M, :N]
    return y


def init_spose_params(key, in_size, out_size, dtype=jnp.float32):
    """Matches SPoSE._initialize_weights: W ~ Normal(0.1, 0.01), shape (out, in)."""
    mean, std = 0.1, 0.01
    return mean + std * jax.random.normal(key, (out_size, in_size), dtype=dtype)


def _bf16_ref(x, w_t):
    """Reference matching the bf16-operand / f32-accumulate kernel semantics."""
    return jnp.dot(
        x.astype(jnp.bfloat16).astype(jnp.float32),
        w_t.astype(jnp.bfloat16).astype(jnp.float32),
        precision=jax.lax.Precision.HIGHEST,
    )


if __name__ == "__main__":
    key = jax.random.PRNGKey(0)
    k_w, k_x, k_w3, k_x3 = jax.random.split(key, 4)

    # --- 1) Small, tile-aligned demo shape (single K step, 2 N blocks). -----
    batch, in_size, out_size = 16, 256, 256
    W = init_spose_params(k_w, in_size, out_size)          # PyTorch layout (out, in)
    x = jax.random.normal(k_x, (batch, in_size), jnp.float32)
    w_t = jnp.asarray(W.T)                                  # (in, out), built once

    y = jax.block_until_ready(spose_forward(x, w_t))        # default bf16 operands
    assert y.shape == (batch, out_size) and y.dtype == x.dtype
    assert jnp.allclose(y, _bf16_ref(x, w_t), atol=2e-2, rtol=2e-2)

    # --- 2) Full-f32 operand path, tight tolerance. -------------------------
    y32 = jax.block_until_ready(spose_forward(x, w_t, compute_dtype=None))
    y32_ref = jnp.dot(x, w_t, precision=jax.lax.Precision.HIGHEST)
    assert jnp.allclose(y32, y32_ref, atol=2e-4, rtol=2e-4)

    # --- 3) Realistic ragged SPoSE shape: non-128 multiples, multi-K path. --
    batch3, in3, out3 = 64, 1854, 100
    W3 = init_spose_params(k_w3, in3, out3)
    x3 = jax.random.normal(k_x3, (batch3, in3), jnp.float32)
    w3_t = jnp.asarray(W3.T)
    y3 = jax.block_until_ready(spose_forward(x3, w3_t))     # padded to (2048, 128)
    assert y3.shape == (batch3, out3)
    assert jnp.allclose(y3, _bf16_ref(x3, w3_t), atol=2e-2, rtol=2e-2)

    print("KERNEL_OK")
</pallas_src>

<mosaic_0001>
module attributes {stable_mosaic.version = 11 : i64} {
  func.func @_mm_kernel_single(%arg0: i32, %arg1: i32, %arg2: i32, %arg3: memref<16x256xbf16, #tpu.memory_space<vmem>>, %arg4: memref<256x128xbf16, #tpu.memory_space<vmem>>, %arg5: memref<16x128xf32, #tpu.memory_space<vmem>>) attributes {dimension_semantics = [#tpu.dimension_semantics<parallel>, #tpu.dimension_semantics<parallel>, #tpu.dimension_semantics<arbitrary>], iteration_bounds = array<i64: 1, 2, 1>, scalar_prefetch = 0 : i64, scratch_operands = 0 : i64, tpu.core_type = #tpu.core_type<tc>, window_params = [{transform_indices = @transform_0, window_bounds = array<i64: 16, 256>}, {transform_indices = @transform_1, window_bounds = array<i64: 256, 128>}, {transform_indices = @transform_2, window_bounds = array<i64: 16, 128>}]} {
    %c0 = arith.constant 0 : index
    %c0_0 = arith.constant 0 : index
    %0 = vector.load %arg3[%c0, %c0_0] : memref<16x256xbf16, #tpu.memory_space<vmem>>, vector<16x256xbf16>
    %c0_1 = arith.constant 0 : index
    %c0_2 = arith.constant 0 : index
    %1 = vector.load %arg4[%c0_1, %c0_2] : memref<256x128xbf16, #tpu.memory_space<vmem>>, vector<256x128xbf16>
    %cst = arith.constant dense<0.000000e+00> : vector<16x128xf32>
    %2 = tpu.matmul %0, %1, %cst {dimension_numbers = #tpu.dot_dimension_numbers<[1], [0], [0], [1], [0, 0, 1, 1], [], []>} : vector<16x256xbf16>, vector<256x128xbf16>, vector<16x128xf32> -> vector<16x128xf32>
    %c0_3 = arith.constant 0 : index
    %c0_4 = arith.constant 0 : index
    %3 = vector.load %arg5[%c0_3, %c0_4] : memref<16x128xf32, #tpu.memory_space<vmem>>, vector<16x128xf32>
    tpu.vector_store %arg5[%c0_3, %c0_4], %2 {strides = array<i32>} : memref<16x128xf32, #tpu.memory_space<vmem>>, vector<16x128xf32>,
    return
  }
  func.func @transform_0(%arg0: i32, %arg1: i32, %arg2: i32) -> (i32, i32) {
    %c0_i32 = arith.constant 0 : i32
    return %arg0, %arg2 : i32, i32
  }
  func.func @transform_1(%arg0: i32, %arg1: i32, %arg2: i32) -> (i32, i32) {
    %c0_i32 = arith.constant 0 : i32
    return %arg2, %arg1 : i32, i32
  }
  func.func @transform_2(%arg0: i32, %arg1: i32, %arg2: i32) -> (i32, i32) {
    %c0_i32 = arith.constant 0 : i32
    return %arg0, %arg1 : i32, i32
  }
}

</mosaic_0001>

<bundles_post_ra>
// kernel: spose_forward.1
= control target key start
LH: loop header
LB: loop body
LE: loop exit
PB: predicated region body
PF: predicated region fallthrough
CT: control target
= control target key end

     0   :  { %7 = vsyncpa [#allocation4], 0  ;;  %s1125_s0 = inlined_call_operand.vmem [shape: bf16[16,256], index: 0, kind: input, shape index: {}]   ;;  %s1126_s1 = inlined_call_operand.vmem [shape: bf16[256,256], index: 1, kind: input, shape index: {}]   ;;  %s1127_s2 = inlined_call_operand.hbm [shape: f32[16,256], index: 2, kind: output, shape index: {}]  }
   0x1   :  { %9 = vsyncpa [#allocation4 + $0x1], 0  ;;  %s910_s9 = smov 0   ;;  %s912_s10 = smov 0  }
   0x2   :  { %s914_s11 = smov 0   ;;  %s916_s12 = smov 0  }
   0x3   :  { %s918_s13 = smov 0   ;;  %s920_s14 = smov 0  }
   0x4 LB: > { %s682_s15 = sadd.s32 4294967295, %s889_s14   ;;  %s683_s16 = sadd.s32 4294967294, %s889_s14   ;;  %s889_s14 = sphi %s920_s14, %s15_s14   ;;  %s885_s13 = sphi %s918_s13, %s1134_s13   ;;  %s881_s12 = sphi %s916_s12, %s1133_s12   ;;  %s877_s11 = sphi %s914_s11, %s1132_s11   ;;  %s873_s10 = sphi %s912_s10, %s1131_s10   ;;  %s869_s9 = sphi %s910_s9, %s1130_s9  }
   0x5   : > { %s30_s17 = sadd.s32 1, %s885_s13  ;;  %s71_s18 = sadd.s32 1, %s877_s11 }
   0x6   : > { %p32_p0 = scmp.ge.s32.totalorder %s30_s17, 2  ;;  %p78_p1 = scmp.ne.s32.totalorder %s877_s11, %s873_s10 }
   0x7   : > { %p79_p2 = scmp.eq.s32.totalorder %s889_s14, 0  ;;  %p110_p3 = scmp.eq.s32.totalorder %s682_s15, 1 }
   0x8   : > { %s1136_s17 = smov (%p32_p0, %s30_s17), 0  ;;  %p115_p6 = scmp.ne.s32.totalorder %s873_s10, %s869_s9 }
   0x9   : > { %p80_p4 = por %p79_p2, %p78_p1  ;;  %p949_p5 = por %p110_p3, %p78_p1 }
   0xa   : > { %s67_s20 = ssub.s32 %s885_s13, %s1136_s17  ;;  %p116_p8 = scmp.eq.s32.totalorder %s683_s16, 1 }
   0xb   : > { %p69_p7 = scmp.eq.s32.totalorder %s67_s20, 0  ;;  %p686_p10 = scmp.ge.s32.totalorder %s889_s14, 2 }
   0xc   : > { %p960_p9 = por %p116_p8, %p115_p6 }
   0xd   : > { %s958_s21 = scalar_select %p69_p7, %s877_s11, %s71_s18  }
   0xe   : > { %147 = sbr.rel (%p686_p10) target bundleno = 44 (0x2c), region = 20 }
  0x13   : > { %150 = sbr.rel (!%p80_p4) target bundleno = 44 (0x2c), region = 24  ;;  %s152_s23 = sand.u32 (%p80_p4), 1, %s877_s11  }
  0x14   : > { %s688_s24 = sshll.u32 (%p80_p4), %s885_s13, 2  ;;  %s687_s25 = sshll.u32 (%p80_p4), %s152_s23, 7 }
  0x15   : > { %s972_s28 = scalar_lea.vmem (%p80_p4), %s1126_s1, %s688_s24  ;;  %s976_s29 = scalar_lea.vmem (%p80_p4), [#allocation2], %s687_s25 }
  0x16   : > { %v176_v0 = vld [vmem:[%s972_s28] sm:$0xf] (%p80_p4)  ;;  %v178_v1 = vld [vmem:[%s972_s28 + $0x8] sm:$0xf] (%p80_p4)  ;;  %v180_v2 = vld [vmem:[%s972_s28 + $0x10] sm:$0xf] (%p80_p4) }
  0x17   : > { %177 = vst [vmem:[%s976_s29] sm:$0xf] (%p80_p4), %v176_v0  ;;  %179 = vst [vmem:[%s976_s29 + $0x4] sm:$0xf] (%p80_p4), %v178_v1  ;;  %v182_v3 = vld [vmem:[%s972_s28 + $0x18] sm:$0xf] (%p80_p4) }
  0x18   : > { %v184_v4 = vld [vmem:[%s972_s28 + $0x20] sm:$0xf]  ;;  %181 = vst [vmem:[%s976_s29 + $0x8] sm:$0xf] %v180_v2  ;;  %183 = vst [vmem:[%s976_s29 + $0xc] sm:$0xf] %v182_v3 }
  0x19   : > { %185 = vst [vmem:[%s976_s29 + $0x10] sm:$0xf] %v184_v4  ;;  %v186_v5 = vld [vmem:[%s972_s28 + $0x28] sm:$0xf]  ;;  %v188_v6 = vld [vmem:[%s972_s28 + $0x30] sm:$0xf] }
  0x1a   : > { %v190_v7 = vld [vmem:[%s972_s28 + $0x38] sm:$0xf]  ;;  %187 = vst [vmem:[%s976_s29 + $0x14] sm:$0xf] %v186_v5  ;;  %189 = vst [vmem:[%s976_s29 + $0x18] sm:$0xf] %v188_v6 }
  0x1b   : > { %191 = vst [vmem:[%s976_s29 + $0x1c] sm:$0xf] %v190_v7  ;;  %v192_v8 = vld [vmem:[%s972_s28 + $0x40] sm:$0xf]  ;;  %v194_v9 = vld [vmem:[%s972_s28 + $0x48] sm:$0xf] }
  0x1c   : > { %v196_v10 = vld [vmem:[%s972_s28 + $0x50] sm:$0xf]  ;;  %193 = vst [vmem:[%s976_s29 + $0x20] sm:$0xf] %v192_v8  ;;  %195 = vst [vmem:[%s976_s29 + $0x24] sm:$0xf] %v194_v9 }
  0x1d   : > { %197 = vst [vmem:[%s976_s29 + $0x28] sm:$0xf] %v196_v10  ;;  %v198_v11 = vld [vmem:[%s972_s28 + $0x58] sm:$0xf]  ;;  %v200_v12 = vld [vmem:[%s972_s28 + $0x60] sm:$0xf] }
  0x1e   : > { %v202_v13 = vld [vmem:[%s972_s28 + $0x68] sm:$0xf]  ;;  %199 = vst [vmem:[%s976_s29 + $0x2c] sm:$0xf] %v198_v11  ;;  %201 = vst [vmem:[%s976_s29 + $0x30] sm:$0xf] %v200_v12 }
  0x1f   : > { %203 = vst [vmem:[%s976_s29 + $0x34] sm:$0xf] %v202_v13  ;;  %v204_v14 = vld [vmem:[%s972_s28 + $0x70] sm:$0xf]  ;;  %v206_v15 = vld [vmem:[%s972_s28 + $0x78] sm:$0xf] }
  0x20   : > { %v208_v16 = vld [vmem:[%s972_s28 + $0x80] sm:$0xf]  ;;  %205 = vst [vmem:[%s976_s29 + $0x38] sm:$0xf] %v204_v14  ;;  %207 = vst [vmem:[%s976_s29 + $0x3c] sm:$0xf] %v206_v15 }
  0x21   : > { %209 = vst [vmem:[%s976_s29 + $0x40] sm:$0xf] %v208_v16  ;;  %v210_v17 = vld [vmem:[%s972_s28 + $0x88] sm:$0xf]  ;;  %v212_v18 = vld [vmem:[%s972_s28 + $0x90] sm:$0xf] }
  0x22   : > { %v214_v19 = vld [vmem:[%s972_s28 + $0x98] sm:$0xf]  ;;  %211 = vst [vmem:[%s976_s29 + $0x44] sm:$0xf] %v210_v17  ;;  %213 = vst [vmem:[%s976_s29 + $0x48] sm:$0xf] %v212_v18 }
  0x23   : > { %215 = vst [vmem:[%s976_s29 + $0x4c] sm:$0xf] %v214_v19  ;;  %v216_v20 = vld [vmem:[%s972_s28 + $0xa0] sm:$0xf]  ;;  %v218_v21 = vld [vmem:[%s972_s28 + $0xa8] sm:$0xf] }
  0x24   : > { %v220_v22 = vld [vmem:[%s972_s28 + $0xb0] sm:$0xf]  ;;  %217 = vst [vmem:[%s976_s29 + $0x50] sm:$0xf] %v216_v20  ;;  %219 = vst [vmem:[%s976_s29 + $0x54] sm:$0xf] %v218_v21 }
  0x25   : > { %221 = vst [vmem:[%s976_s29 + $0x58] sm:$0xf] %v220_v22  ;;  %v222_v23 = vld [vmem:[%s972_s28 + $0xb8] sm:$0xf]  ;;  %v224_v24 = vld [vmem:[%s972_s28 + $0xc0] sm:$0xf] }
  0x26   : > { %v226_v25 = vld [vmem:[%s972_s28 + $0xc8] sm:$0xf]  ;;  %223 = vst [vmem:[%s976_s29 + $0x5c] sm:$0xf] %v222_v23  ;;  %225 = vst [vmem:[%s976_s29 + $0x60] sm:$0xf] %v224_v24 }
  0x27   : > { %227 = vst [vmem:[%s976_s29 + $0x64] sm:$0xf] %v226_v25  ;;  %v228_v26 = vld [vmem:[%s972_s28 + $0xd0] sm:$0xf]  ;;  %v230_v27 = vld [vmem:[%s972_s28 + $0xd8] sm:$0xf] }
  0x28   : > { %v232_v28 = vld [vmem:[%s972_s28 + $0xe0] sm:$0xf]  ;;  %229 = vst [vmem:[%s976_s29 + $0x68] sm:$0xf] %v228_v26  ;;  %231 = vst [vmem:[%s976_s29 + $0x6c] sm:$0xf] %v230_v27 }
  0x29   : > { %233 = vst [vmem:[%s976_s29 + $0x70] sm:$0xf] %v232_v28  ;;  %v234_v29 = vld [vmem:[%s972_s28 + $0xe8] sm:$0xf]  ;;  %v236_v30 = vld [vmem:[%s972_s28 + $0xf0] sm:$0xf] }
  0x2a   : > { %v238_v31 = vld [vmem:[%s972_s28 + $0xf8] sm:$0xf]  ;;  %235 = vst [vmem:[%s976_s29 + $0x74] sm:$0xf] %v234_v29  ;;  %237 = vst [vmem:[%s976_s29 + $0x78] sm:$0xf] %v236_v30 }
  0x2b   : > { %239 = vst [vmem:[%s976_s29 + $0x7c] sm:$0xf] %v238_v31 }
  0x2c PF: > { %p689_p11 = scmp.ge.s32.totalorder %s889_s14, 1  ;;  %p326_p12 = scmp.lt.s32.totalorder %s889_s14, 3 }
  0x2e   : > { %p327_p13 = pnand %p689_p11, %p326_p12 }
  0x2f   : > { %s1043_s30 = sand.u32 (!%p327_p13), 1, %s873_s10   ;;  %s711_s20 = sshll.u32 (!%p327_p13), %s881_s12, 7 }
  0x30   : > { %330 = sbr.rel (%p327_p13) target bundleno = 302 (0x12e), region = 65  ;;  %s690_s3 = sshll.u32 (!%p327_p13), %s1043_s30, 7 }
  0x31   : > { %s1049_s6 = scalar_lea.vmem (!%p327_p13), [#allocation2], %s690_s3  ;;  %s691_s15 = sshll.u32 (!%p327_p13), %s1043_s30, 4 }
  0x32   : > { %s363_s16 = scalar_lea.vmem (!%p327_p13), [#allocation3], %s691_s15  ;;  %s1077_s25 = scalar_lea.hbm (!%p327_p13), %s1127_s2, %s711_s20 }
  0x33   : > { %s578_s18 = sshll.u32 (!%p327_p13), %s363_s16, 4  ;;  %s563_s26 = scalar_lea.sflag (!%p327_p13), [#allocation4], %s1043_s30  ;;  %s1072_s18 = int_to_ptr.vmem [resolvable:$true] %s578_s18 }
  0x34   : > { %s813_s27 = scalar_lea.vmem (!%p327_p13), %s1072_s18, 256  ;;  %s891_s12 = smov (!%p327_p13), [#allocation3]  }
  0x35   : > { %v812_v32 = vld [vmem:[%s1125_s0 + $0x4] ss:$8 sps:$4 sm:$0xff]   ;;  %v794_v33 = vld [vmem:[%s1049_s6 + $0x78] sm:$0xff]   ;;  %v796_v35 = vld [vmem:[%s1049_s6 + $0x70] sm:$0xff]   ;;  %p814_p0 = scmp.ne.s32.totalorder %s1072_s18, %s813_s27  ;;  %s817_s28 = sshll.u32 %s891_s12, 4  ;;  %s818_s28 = int_to_ptr.vmem [resolvable:$false] %s817_s28 }
  0x36   : > { %551 = vmatprep.mubr.bf16.mxu0 %v812_v32  ;;  %v795_v34 = vld [vmem:[%s1049_s6 + $0x38] sm:$0xff]   ;;  %714 = vmatprep.subr.bf16.mxu0 %v794_v33  ;;  %v797_v36 = vld [vmem:[%s1049_s6 + $0x30] sm:$0xff]   ;;  %v798_v37 = vld [vmem:[%s1049_s6 + $0x68] sm:$0xff]   ;;  %s819_s29 = scalar_lea.vmem %s818_s28, 512  ;;  %p820_p3 = scmp.lt.s32.totalorder %s1072_s18, %s818_s28 }
  0x37   : > { %715 = vmatpush3.bf16.msra.mxu0 %v795_v34  ;;  %v799_v38 = vld [vmem:[%s1049_s6 + $0x28] sm:$0xff]   ;;  %v800_v39 = vld [vmem:[%s1049_s6 + $0x60] sm:$0xff]   ;;  %v802_v41 = vld [vmem:[%s1049_s6 + $0x58] sm:$0xff]   ;;  %p815_p1 = pnand %p814_p0, %p949_p5  ;;  %p821_p4 = scmp.lt.s32.totalorder %s819_s29, %s813_s27 }
  0x38   : > { %716 = vmatprep.subr.bf16.mxu0 %v796_v35  ;;  %v801_v40 = vld [vmem:[%s1049_s6 + $0x20] sm:$0xff]   ;;  %v803_v42 = vld [vmem:[%s1049_s6 + $0x18] sm:$0xff]   ;;  %v804_v43 = vld [vmem:[%s1049_s6 + $0x50] sm:$0xff]  }
  0x39   : > { %v805_v44 = vld [vmem:[%s1049_s6 + $0x10] sm:$0xff]   ;;  %v806_v45 = vld [vmem:[%s1049_s6 + $0x48] sm:$0xff]   ;;  %v808_v47 = vld [vmem:[%s1049_s6 + $0x40] sm:$0xff]   ;;  %p816_p2 = pneg %p815_p1  ;;  %p822_p6 = por %p821_p4, %p820_p3 }
  0x3a   : > { %v807_v46 = vld [vmem:[%s1049_s6 + $0x8] sm:$0xff]   ;;  %v809_v48 = vld [vmem:[%s1049_s6] sm:$0xff]  }
  0x3b   : > { %717 = vmatpush3.bf16.msra.mxu0 %v797_v36  ;;  %v810_v49 = vld [vmem:[%s1125_s0] ss:$8 sps:$4 sm:$0xff]   ;;  %p823_p7 = pnand %p822_p6, %p816_p2 }
  0x3c   : > { %718 = vmatprep.subr.bf16.mxu0 %v798_v37 }
  0x3f   : > { %719 = vmatpush3.bf16.msra.mxu0 %v799_v38 }
  0x40   : > { %720 = vmatprep.subr.bf16.mxu0 %v800_v39 }
  0x43   : > { %721 = vmatpush3.bf16.msra.mxu0 %v801_v40 }
  0x44   : > { %722 = vmatprep.subr.bf16.mxu0 %v802_v41 }
  0x47   : > { %723 = vmatpush3.bf16.msra.mxu0 %v803_v42 }
  0x48   : > { %724 = vmatprep.subr.bf16.mxu0 %v804_v43 }
  0x4b   : > { %725 = vmatpush3.bf16.msra.mxu0 %v805_v44 }
  0x4c   : > { %726 = vmatprep.subr.bf16.mxu0 %v806_v45 }
  0x4f   : > { %727 = vmatpush3.bf16.msra.mxu0 %v807_v46 }
  0x50   : > { %728 = vmatprep.subr.bf16.mxu0 %v808_v47 }
  0x53   : > { %729 = vmatpush3.bf16.msra.mxu0 %v809_v48 }
  0x56   : > { %552 = vmatmul.mubr.bf16.vlgmr.msra.gmra.mxu0 %v810_v49 }
 0x116   : > { %v730_v50 = vpop.f32.mrf.mxu0 }
 0x118   : > { %v731_v51 = vpop.f32.mrf.mxu0 }
 0x119   : > { %v732_v52 = vadd.f32 %v731_v51, %v730_v50 }
 0x11a   : > { %v733_v53 = vpop.f32.mrf.mxu0 }
 0x11b   : > { %560 = vst [vmem:[%s363_s16] sm:$0xff] %v732_v52 }
 0x11c   : > { %v734_v54 = vpop.f32.mrf.mxu0 }
 0x11d   : > { %v735_v55 = vadd.f32 %v734_v54, %v733_v53 }
 0x11f   : > { %561 = vst [vmem:[%s363_s16 + $0x8] sm:$0xff] %v735_v55 }
 0x120   : > { %826 = shalt.err (!%p823_p7)
}
 0x121   : > { %s827_s3 = scalar_lea.hbm %s1077_s25, 256  ;;  %s831_s6 = scalar_lea.hbm %s1127_s2, 512 }
 0x122   : > { %p828_p8 = scmp.ne.s32.totalorder %s1077_s25, %s827_s3  ;;  %p832_p13 = scmp.lt.s32.totalorder %s1077_s25, %s1127_s2 }
 0x123   : > { %p833_p0 = scmp.lt.s32.totalorder %s831_s6, %s827_s3 }
 0x124   : > { %p829_p11 = pnand %p828_p8, %p949_p5 }
 0x125   : > { %p834_p1 = por %p833_p0, %p832_p13 }
 0x126   : > { %p830_p12 = pneg %p829_p11 }
 0x128   : > { %p835_p2 = pnand %p834_p1, %p830_p12 }
 0x12a   : > { %838 = shalt.err (!%p835_p2)
}
 0x12b   : > { %s892_s15 = smov 128   ;;  %s893_s16 = smov 256  }
 0x12c   : > { %s894_s20 = smov 8  }
 0x12d   : > { %736 = dma.vmem_to_hbm [thread:$0]  (%p949_p5), %s1072_s18, 256, %s1077_s25, %s563_s26, %s892_s15, %s893_s16, %s894_s20  }
 0x12e PF: > { %s593_s23 = sand.u32 1, %s869_s9   ;;  %p739_p3 = pnand %p686_p10, %p960_p9 }
 0x12f   : > { %s594_s24 = scalar_lea.sflag [#allocation4], %s593_s23 }
 0x130   : > { %p740_p4 = pneg %p739_p3 }
 0x132   : > { %864 = dma.done.wait (%p740_p4), %s594_s24, 256  }
 0x133   : > { %866 = vsyncadd (%p740_p4), %s594_s24, 4294967040  ;;  %s15_s14 = sadd.s32 1, %s889_s14   ;;  %s1130_s9 = smov %s873_s10 }
 0x134   : > { %p12_p6 = scmp.ge.s32.totalorder %s15_s14, 4   ;;  %s1131_s10 = smov %s877_s11 }
 0x135   : > { %s1132_s11 = smov %s958_s21  ;;  %s1133_s12 = smov %s885_s13 }
 0x136   : > { %s1134_s13 = smov %s1136_s17  ;;  %14 = sbr.rel (!%p12_p6) target bundleno = 4 (0x4), region = 112 }
 0x13b   :  { %599 = vsyncpa [#allocation4], 1 }
 0x13c   :  { %601 = vsyncpa [#allocation4 + $0x1], 1 }

</bundles_post_ra>
